<compile_context>
chip_gen: v5e
topology: v5e:2x2
jax: 0.10.0
libtpu: 0.0.40
codegen_flags: <defaults>
</compile_context>

<pallas_src>
import jax
import jax.numpy as jnp
from jax.experimental import pallas as pl
from jax.experimental.pallas import tpu as pltpu  # noqa: F401  (TPU backend)

HIDDEN_LAYER = 128
BN_EPS = 1e-5
LANE = 128

# Rows of the packed parameter slab (8, 128) f32 — exactly one vreg.
ROW_GAMMA, ROW_BETA, ROW_B1, ROW_B2, ROW_W3, ROW_B3 = 0, 1, 2, 3, 4, 5


def critic_kernel(x_ref, w1_ref, w2_ref, slab_ref, o_ref):
    # Whole problem fits in VMEM -> single grid point, everything resident.
    x = x_ref[...].astype(jnp.float32)                 # (B, F)
    slab = slab_ref[...]                               # (8, 128) f32, one vreg
    F = x.shape[1]

    gamma = slab[ROW_GAMMA:ROW_GAMMA + 1, :F]          # (1, F)
    beta = slab[ROW_BETA:ROW_BETA + 1, :F]             # (1, F)
    b1 = slab[ROW_B1:ROW_B1 + 1, :]                    # (1, 128)
    b2 = slab[ROW_B2:ROW_B2 + 1, :]                    # (1, 128)
    w3 = slab[ROW_W3:ROW_W3 + 1, :]                    # (1, 128)
    b3 = slab[ROW_B3:ROW_B3 + 1, 0:1]                  # (1, 1)

    # BatchNorm1d (training mode), two-pass variance (stable, matches PyTorch).
    mean = jnp.mean(x, axis=0, keepdims=True)          # (1, F)
    cent = x - mean
    var = jnp.mean(cent * cent, axis=0, keepdims=True)
    xn = cent * jax.lax.rsqrt(var + BN_EPS) * gamma + beta

    # fc1 + ReLU — bf16 operands on the MXU, f32 accumulation.
    h1 = jnp.dot(xn.astype(jnp.bfloat16), w1_ref[...],
                 preferred_element_type=jnp.float32) + b1
    h1 = jnp.maximum(h1, 0.0)

    # fc2 + ReLU
    h2 = jnp.dot(h1.astype(jnp.bfloat16), w2_ref[...],
                 preferred_element_type=jnp.float32) + b2
    h2 = jnp.maximum(h2, 0.0)

    # fc3 -> Q.  N=1 head: VPU multiply + XLU lane reduce (no wasted MXU pass).
    q = jnp.sum(h2 * w3, axis=-1, keepdims=True) + b3  # (B, 1)

    # Lane-dense store: fill all 128 lanes with Q; wrapper slices [:, :1].
    o_ref[...] = jnp.broadcast_to(q, o_ref.shape).astype(o_ref.dtype)


@jax.jit
def critic_forward(inputs, actions, params):
    w1, w2, slab = params
    # Tiny concat (layout plumbing) done in the wrapper: one input DMA instead
    # of two, and fc1 stays a single MXU dot.
    x = jnp.concatenate([inputs, actions], axis=1).astype(jnp.float32)
    B = x.shape[0]

    full = lambda a: pl.BlockSpec(a.shape, lambda: (0,) * a.ndim)
    args = (x, w1, w2, slab)

    out = pl.pallas_call(
        critic_kernel,
        out_shape=jax.ShapeDtypeStruct((B, LANE), jnp.float32),
        grid=(),
        in_specs=[full(a) for a in args],
        out_specs=pl.BlockSpec((B, LANE), lambda: (0, 0)),
    )(*args)
    return out[:, :1]


def init_params(key, n_inputs, n_actions):
    """Init mirroring the PyTorch module.

    fc1/fc2: U(-1/sqrt(fan_in), 1/sqrt(fan_in)) like torch.nn.Linear default;
    fc3 weight: U(-0.003, 0.003); BatchNorm weight=1, bias=0.
    Weights stored (in, out) and cast to bf16 for the MXU; all small params
    packed into one (8, 128) f32 slab.
    """
    F_total = n_inputs + n_actions
    ks = jax.random.split(key, 6)

    def linear(kw, kb, fan_in, fan_out):
        bound = 1.0 / jnp.sqrt(jnp.float32(fan_in))
        w = jax.random.uniform(kw, (fan_in, fan_out), jnp.float32, -bound, bound)
        b = jax.random.uniform(kb, (fan_out,), jnp.float32, -bound, bound)
        return w, b

    w1, b1 = linear(ks[0], ks[1], F_total, HIDDEN_LAYER)
    w2, b2 = linear(ks[2], ks[3], HIDDEN_LAYER, HIDDEN_LAYER)
    w3 = jax.random.uniform(ks[4], (HIDDEN_LAYER,), jnp.float32, -0.003, 0.003)
    bound3 = 1.0 / jnp.sqrt(jnp.float32(HIDDEN_LAYER))
    b3 = jax.random.uniform(ks[5], (), jnp.float32, -bound3, bound3)

    slab = jnp.zeros((8, LANE), jnp.float32)
    slab = slab.at[ROW_GAMMA, :F_total].set(jnp.ones((F_total,), jnp.float32))
    slab = slab.at[ROW_BETA, :F_total].set(jnp.zeros((F_total,), jnp.float32))
    slab = slab.at[ROW_B1, :].set(b1)
    slab = slab.at[ROW_B2, :].set(b2)
    slab = slab.at[ROW_W3, :].set(w3)
    slab = slab.at[ROW_B3, 0].set(b3)

    return (w1.astype(jnp.bfloat16), w2.astype(jnp.bfloat16), slab)


def critic_reference(inputs, actions, params):
    """Pure-JAX reference with the same precision policy as the kernel
    (bf16 MXU operands, f32 accumulation, f32 BN/ReLU/head)."""
    w1, w2, slab = params
    F = inputs.shape[1] + actions.shape[1]
    gamma = slab[ROW_GAMMA, :F][None, :]
    beta = slab[ROW_BETA, :F][None, :]
    b1 = slab[ROW_B1][None, :]
    b2 = slab[ROW_B2][None, :]
    w3 = slab[ROW_W3][None, :]
    b3 = slab[ROW_B3, 0]

    x = jnp.concatenate([inputs, actions], axis=1).astype(jnp.float32)
    mean = jnp.mean(x, axis=0, keepdims=True)
    cent = x - mean
    var = jnp.mean(cent * cent, axis=0, keepdims=True)
    xn = cent * jax.lax.rsqrt(var + BN_EPS) * gamma + beta

    h1 = jnp.maximum(jnp.dot(xn.astype(jnp.bfloat16), w1,
                             preferred_element_type=jnp.float32) + b1, 0.0)
    h2 = jnp.maximum(jnp.dot(h1.astype(jnp.bfloat16), w2,
                             preferred_element_type=jnp.float32) + b2, 0.0)
    return jnp.sum(h2 * w3, axis=-1, keepdims=True) + b3


if __name__ == "__main__":
    key = jax.random.PRNGKey(0)
    k_in, k_act, k_par = jax.random.split(key, 3)

    B, N_INPUTS, N_ACTIONS = 8, 24, 8                  # F = 32
    inputs = jax.random.normal(k_in, (B, N_INPUTS), jnp.float32)
    actions = jax.random.normal(k_act, (B, N_ACTIONS), jnp.float32)
    params = init_params(k_par, N_INPUTS, N_ACTIONS)

    q = critic_forward(inputs, actions, params)
    q = jax.block_until_ready(q)

    q_ref = critic_reference(inputs, actions, params)
    assert q.shape == (B, 1)
    assert jnp.allclose(q, q_ref, atol=1e-3, rtol=1e-3), (q, q_ref)

    print("KERNEL_OK")
</pallas_src>

<mosaic_0001>
module attributes {stable_mosaic.version = 11 : i64} {
  func.func @critic_kernel(%arg0: memref<8x32xf32, #tpu.memory_space<vmem>>, %arg1: memref<32x128xbf16, #tpu.memory_space<vmem>>, %arg2: memref<128x128xbf16, #tpu.memory_space<vmem>>, %arg3: memref<8x128xf32, #tpu.memory_space<vmem>>, %arg4: memref<8x128xf32, #tpu.memory_space<vmem>>) attributes {dimension_semantics = [], scalar_prefetch = 0 : i64, scratch_operands = 0 : i64, tpu.core_type = #tpu.core_type<tc>} {
    %c0 = arith.constant 0 : index
    %c0_0 = arith.constant 0 : index
    %0 = vector.load %arg0[%c0, %c0_0] : memref<8x32xf32, #tpu.memory_space<vmem>>, vector<8x32xf32>
    %c0_1 = arith.constant 0 : index
    %c0_2 = arith.constant 0 : index
    %1 = vector.load %arg3[%c0_1, %c0_2] : memref<8x128xf32, #tpu.memory_space<vmem>>, vector<8x128xf32>
    %2 = vector.extract_strided_slice %1 {offsets = [0, 0], sizes = [1, 32], strides = [1, 1]} : vector<8x128xf32> to vector<1x32xf32>
    %3 = vector.extract_strided_slice %1 {offsets = [1, 0], sizes = [1, 32], strides = [1, 1]} : vector<8x128xf32> to vector<1x32xf32>
    %4 = vector.extract_strided_slice %1 {offsets = [2, 0], sizes = [1, 128], strides = [1, 1]} : vector<8x128xf32> to vector<1x128xf32>
    %5 = vector.extract_strided_slice %1 {offsets = [3, 0], sizes = [1, 128], strides = [1, 1]} : vector<8x128xf32> to vector<1x128xf32>
    %6 = vector.extract_strided_slice %1 {offsets = [4, 0], sizes = [1, 128], strides = [1, 1]} : vector<8x128xf32> to vector<1x128xf32>
    %7 = vector.extract_strided_slice %1 {offsets = [5, 0], sizes = [1, 1], strides = [1, 1]} : vector<8x128xf32> to vector<1x1xf32>
    %cst = arith.constant dense<0.000000e+00> : vector<32xf32>
    %8 = vector.multi_reduction <add>, %0, %cst [0] : vector<8x32xf32> to vector<32xf32>
    %9 = vector.shape_cast %8 : vector<32xf32> to vector<1x32xf32>
    %cst_3 = arith.constant 8.000000e+00 : f32
    %10 = vector.broadcast %cst_3 : f32 to vector<1x32xf32>
    %11 = arith.divf %9, %10 : vector<1x32xf32>
    %12 = vector.broadcast %11 : vector<1x32xf32> to vector<8x32xf32>
    %13 = arith.subf %0, %12 : vector<8x32xf32>
    %14 = arith.mulf %13, %13 : vector<8x32xf32>
    %cst_4 = arith.constant dense<0.000000e+00> : vector<32xf32>
    %15 = vector.multi_reduction <add>, %14, %cst_4 [0] : vector<8x32xf32> to vector<32xf32>
    %16 = vector.shape_cast %15 : vector<32xf32> to vector<1x32xf32>
    %cst_5 = arith.constant 8.000000e+00 : f32
    %17 = vector.broadcast %cst_5 : f32 to vector<1x32xf32>
    %18 = arith.divf %16, %17 : vector<1x32xf32>
    %cst_6 = arith.constant 9.99999974E-6 : f32
    %19 = vector.broadcast %cst_6 : f32 to vector<1x32xf32>
    %20 = arith.addf %18, %19 : vector<1x32xf32>
    %21 = math.rsqrt %20 : vector<1x32xf32>
    %22 = vector.broadcast %21 : vector<1x32xf32> to vector<8x32xf32>
    %23 = arith.mulf %13, %22 : vector<8x32xf32>
    %24 = vector.broadcast %2 : vector<1x32xf32> to vector<8x32xf32>
    %25 = arith.mulf %23, %24 : vector<8x32xf32>
    %26 = vector.broadcast %3 : vector<1x32xf32> to vector<8x32xf32>
    %27 = arith.addf %25, %26 : vector<8x32xf32>
    %28 = arith.truncf %27 : vector<8x32xf32> to vector<8x32xbf16>
    %c0_7 = arith.constant 0 : index
    %c0_8 = arith.constant 0 : index
    %29 = vector.load %arg1[%c0_7, %c0_8] : memref<32x128xbf16, #tpu.memory_space<vmem>>, vector<32x128xbf16>
    %cst_9 = arith.constant dense<0.000000e+00> : vector<8x128xf32>
    %30 = tpu.matmul %28, %29, %cst_9 {dimension_numbers = #tpu.dot_dimension_numbers<[1], [0], [0], [1], [0, 0, 1, 1], [], []>} : vector<8x32xbf16>, vector<32x128xbf16>, vector<8x128xf32> -> vector<8x128xf32>
    %31 = vector.broadcast %4 : vector<1x128xf32> to vector<8x128xf32>
    %32 = arith.addf %30, %31 : vector<8x128xf32>
    %cst_10 = arith.constant 0.000000e+00 : f32
    %33 = vector.broadcast %cst_10 : f32 to vector<8x128xf32>
    %34 = arith.maximumf %32, %33 : vector<8x128xf32>
    %35 = arith.truncf %34 : vector<8x128xf32> to vector<8x128xbf16>
    %c0_11 = arith.constant 0 : index
    %c0_12 = arith.constant 0 : index
    %36 = vector.load %arg2[%c0_11, %c0_12] : memref<128x128xbf16, #tpu.memory_space<vmem>>, vector<128x128xbf16>
    %cst_13 = arith.constant dense<0.000000e+00> : vector<8x128xf32>
    %37 = tpu.matmul %35, %36, %cst_13 {dimension_numbers = #tpu.dot_dimension_numbers<[1], [0], [0], [1], [0, 0, 1, 1], [], []>} : vector<8x128xbf16>, vector<128x128xbf16>, vector<8x128xf32> -> vector<8x128xf32>
    %38 = vector.broadcast %5 : vector<1x128xf32> to vector<8x128xf32>
    %39 = arith.addf %37, %38 : vector<8x128xf32>
    %cst_14 = arith.constant 0.000000e+00 : f32
    %40 = vector.broadcast %cst_14 : f32 to vector<8x128xf32>
    %41 = arith.maximumf %39, %40 : vector<8x128xf32>
    %42 = vector.broadcast %6 : vector<1x128xf32> to vector<8x128xf32>
    %43 = arith.mulf %41, %42 : vector<8x128xf32>
    %cst_15 = arith.constant dense<0.000000e+00> : vector<8xf32>
    %44 = vector.multi_reduction <add>, %43, %cst_15 [1] : vector<8x128xf32> to vector<8xf32>
    %45 = vector.shape_cast %44 : vector<8xf32> to vector<8x1xf32>
    %46 = vector.broadcast %7 : vector<1x1xf32> to vector<8x1xf32>
    %47 = arith.addf %45, %46 : vector<8x1xf32>
    %48 = vector.shape_cast %47 : vector<8x1xf32> to vector<8x1xf32>
    %49 = vector.broadcast %48 : vector<8x1xf32> to vector<8x128xf32>
    %c0_16 = arith.constant 0 : index
    %c0_17 = arith.constant 0 : index
    %50 = vector.load %arg4[%c0_16, %c0_17] : memref<8x128xf32, #tpu.memory_space<vmem>>, vector<8x128xf32>
    tpu.vector_store %arg4[%c0_16, %c0_17], %49 {strides = array<i32>} : memref<8x128xf32, #tpu.memory_space<vmem>>, vector<8x128xf32>,
    return
  }
}

</mosaic_0001>

<bundles_post_ra>
// kernel: critic_forward.1
= control target key start
LH: loop header
LB: loop body
LE: loop exit
PB: predicated region body
PF: predicated region fallthrough
CT: control target
= control target key end

     0   :  { %9 = vsyncpa [#allocation3], 0  ;;  %s297_s18 = smov [#allocation2]   ;;  %s298_s20 = smov 64   ;;  %s348_s0 = inlined_call_operand.vmem [shape: f32[8,32], index: 0, kind: input, shape index: {}]   ;;  %s349_s1 = inlined_call_operand.vmem [shape: bf16[32,128], index: 1, kind: input, shape index: {}]   ;;  %s350_s2 = inlined_call_operand.hbm [shape: bf16[128,128], index: 2, kind: input, shape index: {}]   ;;  %s351_s3 = inlined_call_operand.vmem [shape: f32[8,128], index: 3, kind: input, shape index: {}]   ;;  %s352_s4 = inlined_call_operand.vmem [shape: f32[8,128], index: 4, kind: output, shape index: {}]  }
   0x1   :  { %s18_s17 = sshll.u32 %s350_s2, 4  ;;  %s20_s19 = sshll.u32 %s297_s18, 4  ;;  %s19_s17 = int_to_ptr.hbm [resolvable:$true] %s18_s17  ;;  %s21_s19 = int_to_ptr.vmem [resolvable:$true] %s20_s19 }
   0x2   :  { %s299_s21 = smov 4  }
   0x3   :  { %26 = dma.hbm_to_vmem [thread:$0]  %s19_s17, 1024, %s21_s19, [#allocation3], %s298_s20, %s298_s20, %s299_s21  }
   0x4   :  { %295 = dma.done.wait [#allocation3], 1024  }
   0x5   :  { %296 = vsyncadd [#allocation3], 4294966272  ;;  %v300_v0 = vmov 8.0   ;;  %vm36_vm0 = vcmask 261120   ;;  %v252_v2 = vld [vmem:[%s349_s1 + $0x8] sm:$0xff]  ;;  %v34_v3 = vld [vmem:[%s348_s0] sm:$0xff] }
   0x6   :  { %267 = vrcp.f32 %v300_v0  ;;  %v37_v4 = vsel %vm36_vm0, %v34_v3, 0.0  ;;  %105 = vmatpush.bf16.msra.mxu0 %v252_v2  ;;  %v251_v6 = vld [vmem:[%s349_s1] sm:$0xff]  ;;  %v260_v27 = vld [vmem:[#allocation2 + $0x38] sm:$0xff]  ;;  %v259_v29 = vld [vmem:[#allocation2 + $0x30] sm:$0xff]  ;;  %v301_v0 = vmov 0  }
   0x7   :  { %v38_v7 = vrot.slane %v37_v4, 4  ;;  %179 = vmatpush.bf16.msra.mxu1 %v260_v27  ;;  %v258_v31 = vld [vmem:[#allocation2 + $0x28] sm:$0xff]  ;;  %v257_v32 = vld [vmem:[#allocation2 + $0x20] sm:$0xff]  ;;  %v256_v35 = vld [vmem:[#allocation2 + $0x18] sm:$0xff]  ;;  %266 = vset.pattern.permute.xlu0 %v301_v0 }
   0x8   :  { %v255_v38 = vld [vmem:[#allocation2 + $0x10] sm:$0xff]  ;;  %v35_v39 = vld [vmem:[%s351_s3] sm:$0xff]  ;;  %v254_v49 = vld [vmem:[#allocation2 + $0x8] sm:$0xff] }
   0x9   :  { %v39_v9 = vadd.f32 %v38_v7, %v37_v4  ;;  %v74_v42 = vperm.slane %v35_v39, 0  ;;  %v76_v45 = vperm.slane %v35_v39, 1  ;;  %v253_v50 = vld [vmem:[#allocation2] sm:$0xff]  ;;  %v83_v51 = vperm.slane %v35_v39, 2 }
   0xa   :  { %106 = vmatpush.bf16.msra.mxu0 %v251_v6  ;;  %v130_v57 = vperm.slane %v35_v39, 3  ;;  %v193_v60 = vperm.slane %v35_v39, 4 }
   0xb   :  { %v40_v11 = vrot.slane %v39_v9, 2  ;;  %180 = vmatpush.bf16.msra.mxu1 %v259_v29 }
   0xc   :  { %v268_v1 = vpop.eup %267 }
   0xd   :  { %v45_v5 = vmul.f32 8.0, %v268_v1  ;;  %v41_v13 = vadd.f32 %v40_v11, %v39_v9  ;;  %vm49_vm1 = vweird.f32 %v268_v1 }
   0xf   :  { %v46_v8 = vsub.f32 1.0, %v45_v5  ;;  %v42_v14 = vrot.slane %v41_v13, 1  ;;  %181 = vmatpush.bf16.msra.mxu1 %v258_v31 }
  0x11   :  { %v47_v10 = vmul.f32 %v268_v1, %v46_v8  ;;  %v43_v16 = vadd.f32 %v42_v14, %v41_v13 }
  0x13   :  { %v48_v12 = vadd.f32 %v268_v1, %v47_v10  ;;  %182 = vmatpush.bf16.msra.mxu1 %v257_v32 }
  0x15   :  { %v50_v15 = vsel %vm49_vm1, %v268_v1, %v48_v12  ;;  %v197_v1 = vperm.slane %v35_v39, 5 }
  0x16   :  { %v51_v17 = vmul.f32 %v50_v15, %v43_v16 }
  0x17   :  { %183 = vmatpush.bf16.msra.mxu1 %v256_v35 }
  0x18   :  { %v52_v18 = vsub.f32 %v34_v3, %v51_v17 }
  0x1a   :  { %v53_v19 = vmul.f32 %v52_v18, %v52_v18 }
  0x1b   :  { %184 = vmatpush.bf16.msra.mxu1 %v255_v38 }
  0x1c   :  { %v54_v20 = vsel %vm36_vm0, %v53_v19, 0.0 }
  0x1d   :  { %v55_v21 = vrot.slane %v54_v20, 4 }
  0x1f   :  { %v56_v22 = vadd.f32 %v55_v21, %v54_v20  ;;  %185 = vmatpush.bf16.msra.mxu1 %v254_v49 }
  0x21   :  { %v57_v23 = vrot.slane %v56_v22, 2 }
  0x23   :  { %v58_v24 = vadd.f32 %v57_v23, %v56_v22  ;;  %186 = vmatpush.bf16.msra.mxu1 %v253_v50 }
  0x25   :  { %v59_v25 = vrot.slane %v58_v24, 1 }
  0x27   :  { %v60_v26 = vadd.f32 %v59_v25, %v58_v24 }
  0x29   :  { %v61_v28 = vmul.f32 %v60_v26, %v50_v15 }
  0x2b   :  { %v62_v30 = vadd.f32 1e-05, %v61_v28 }
  0x2d   :  { %269 = vrsqrt.f32 %v62_v30  ;;  %vm69_vm2 = vweird.f32 %v62_v30 }
  0x33   :  { %v270_v33 = vpop.eup %269 }
  0x34   :  { %v64_v34 = vmul.f32 %v270_v33, %v62_v30  ;;  %vm70_vm3 = vweird.f32 %v270_v33 }
  0x35   :  { %vm71_vm4 = vmor %vm69_vm2, %vm70_vm3 }
  0x36   :  { %v65_v36 = vmul.f32 %v270_v33, %v64_v34 }
  0x38   :  { %v66_v37 = vmul.f32 0.5, %v65_v36 }
  0x3a   :  { %v67_v40 = vsub.f32 1.5, %v66_v37 }
  0x3c   :  { %v68_v41 = vmul.f32 %v270_v33, %v67_v40 }
  0x3e   :  { %v72_v43 = vsel %vm71_vm4, %v270_v33, %v68_v41 }
  0x3f   :  { %v73_v44 = vmul.f32 %v72_v43, %v52_v18 }
  0x41   :  { %v75_v46 = vmul.f32 %v74_v42, %v73_v44 }
  0x43   :  { %v77_v47 = vadd.f32 %v76_v45, %v75_v46 }
  0x45   :  { %v78_v48 = vpack.c.bf16 %v77_v47, %v77_v47 }
  0x47   :  { %218 = vmatmul.msk.bf16.vlgmr.msra.gmra.mxu0 %vm36_vm0, %v78_v48 }
  0xc4   :  { %v108_v52 = vpop.f32.mrf.mxu0 }
  0xc5   :  { %v109_v53 = vadd.f32 %v108_v52, %v83_v51 }
  0xc7   :  { %v112_v54 = vmax.f32 %v109_v53, 0.0 }
  0xc9   :  { %v113_v55 = vpack.c.bf16 %v112_v54, %v112_v54 }
  0xcb   :  { %187 = vmatmul.bf16.vlgmr.msra.gmra.mxu1 %v113_v55 }
  0xcc   :  { %v110_v56 = vpop.f32.mrf.mxu0 }
 0x148   :  { %v188_v58 = vpop.f32.mrf.mxu1 }
 0x149   :  { %v189_v59 = vadd.f32 %v188_v58, %v130_v57 }
 0x14b   :  { %v192_v61 = vmax.f32 %v189_v59, 0.0 }
 0x14d   :  { %v194_v62 = vmul.f32 %v193_v60, %v192_v61 }
 0x14f   :  { %195 = vadd.xlane.f32.xlu0 %v194_v62 }
 0x150   :  { %v190_v63 = vpop.f32.mrf.mxu1 }
 0x1c2   :  { %v196_v2 = vpop.xlane.xlu0 %195 }
 0x1c3   :  { %v198_v3 = vadd.f32 %v197_v1, %v196_v2 }
 0x1c5   :  { %201 = vperm.xlu0 %266, %v198_v3  }
 0x237   :  { %v202_v4 = vpop.permute.xlu0 %201 }
 0x238   :  { %204 = vst [vmem:[%s352_s4] sm:$0xff] %v202_v4 }
 0x239   :  { %209 = vsyncpa [#allocation3], 1 }

</bundles_post_ra>
